<compile_context>
chip_gen: v7x
topology: tpu7x:2x2x1
jax: 0.10.0
libtpu: 0.0.40
codegen_flags: <defaults>
</compile_context>

<pallas_src>
import functools

import jax
import jax.numpy as jnp
from jax.experimental import pallas as pl
from jax.experimental.pallas import tpu as pltpu


# --------------------------- VMEM budget (per-generation) --------------------

@functools.lru_cache(maxsize=1)
def _vmem_budget_bytes():
    """~80% of physical VMEM; conservative 64 MiB fallback (v7x physical)."""
    cap = 64 * 1024 * 1024
    try:
        info = pltpu.get_tpu_info()
        cap_attr = getattr(info, "vmem_capacity_bytes", None)
        if cap_attr:
            cap = int(cap_attr)
    except Exception:
        pass
    return max(16 * 1024 * 1024, int(cap * 0.8))


def _round_up(x, m):
    return ((x + m - 1) // m) * m


def _block_diag(a):
    """(H, F) attention vectors -> (H*F, H) block-diagonal matrix so that
    feat(N, H*F) @ blockdiag gives per-head <feat_h, a_h> logits as (N, H)."""
    h, f = a.shape
    out = jnp.zeros((h * f, h), jnp.float32)
    for i in range(h):
        out = out.at[i * f:(i + 1) * f, i].set(a[i])
    return out


# ------------------------------- tile pickers --------------------------------

def _pick_stage1_tile(n):
    cands = [t for t in (512, 256, 128, 64, 32, 16, 8) if t <= n and n % t == 0]
    pref = [t for t in cands if n // t >= 2] or cands
    return pref[0] if pref else n


def _stage2_vmem_bytes(td, ts, num_heads, hf_pad):
    lane = 128
    adj = 2 * td * ts * 2                      # adj additive-bias tile (bf16), 2 bufs
    feat = 2 * num_heads * ts * lane * 2       # head-major feat(+ones), bf16, lane-padded
    el = 2 * num_heads * max(ts, lane) * 4     # (H,1,Ts) f32
    er = 2 * num_heads * td * lane * 4         # (H,Td,1) f32, lane-padded
    outb = 2 * td * hf_pad * 2                 # bf16 output tile (resident)
    scr = 2 * num_heads * td * lane * 4        # acc + m scratch, lane-padded
    tmp = 6 * td * ts * 4                      # f32 e/p temporaries + headroom
    return adj + feat + el + er + outb + scr + tmp


def _pick_stage2_tiles(n, num_heads, hf_pad, budget):
    src_cands = [t for t in (1024, 512, 256, 128) if t <= n and n % t == 0] or [n]
    dst_cands = [t for t in (512, 256, 128, 64, 32, 16, 8)
                 if t <= n and n % t == 0] or [n]
    # Prefer >= 2 dst steps so the 'parallel' axis can shard across TensorCores.
    dst_pref = [t for t in dst_cands if n // t >= 2] or dst_cands
    limit = budget // 2                        # headroom for compiler scratch
    for ts in src_cands:
        for td in dst_pref:
            if _stage2_vmem_bytes(td, ts, num_heads, hf_pad) <= limit:
                return td, ts
    return dst_pref[-1], src_cands[-1]


# ----------------- stage 1: combined = X @ [W | W@al | W@ar | 0] -------------

def _project_kernel(x_ref, w_ref, out_ref):
    out_ref[...] = jnp.dot(
        x_ref[...], w_ref[...],
        preferred_element_type=jnp.float32).astype(out_ref.dtype)


# ----------- stage 2: dst x src tiled online-softmax + aggregation -----------

def _gat_attn_kernel(adjb_ref, el_ref, er_ref, feat_ref, bias_ref, out_ref,
                     m_sc, acc_sc, *, num_heads, out_feats, hf, hf_pad,
                     negative_slope):
    j = pl.program_id(1)

    @pl.when(j == 0)
    def _():
        m_sc[...] = jnp.full(m_sc.shape, -1e30, jnp.float32)
        acc_sc[...] = jnp.zeros(acc_sc.shape, jnp.float32)

    mask = adjb_ref[...].astype(jnp.float32)       # (Td, Ts) additive -1e30 mask

    for h in range(num_heads):                     # static unroll, small H
        s = er_ref[h] + el_ref[h]                  # (Td,1)+(1,Ts) -> (Td,Ts)
        s = jnp.maximum(s, negative_slope * s)     # leaky_relu (0 < slope < 1)
        e = s + mask                               # off-edges ~ -1e30
        m_prev = m_sc[h]                           # (Td, 1)
        m_new = jnp.maximum(m_prev, jnp.max(e, axis=-1, keepdims=True))
        alpha = jnp.exp(m_prev - m_new)            # rescale previous partials
        p = jnp.exp(e - m_new)                     # masked entries underflow to 0
        # ones column of feat_aug makes the running denominator come out of the
        # MXU aggregation for free (last output column).
        acc_sc[h] = alpha * acc_sc[h] + jnp.dot(
            p.astype(jnp.bfloat16), feat_ref[h],
            preferred_element_type=jnp.float32)    # (Td, F+1)
        m_sc[h] = m_new

    @pl.when(j == pl.num_programs(1) - 1)
    def _():
        td = out_ref.shape[0]
        outs = []
        for h in range(num_heads):
            a = acc_sc[h]                                           # (Td, F+1)
            denom = jnp.maximum(a[:, out_feats:out_feats + 1], 1e-20)
            outs.append(a[:, :out_feats] * pl.reciprocal(denom, approx=True))
        if hf_pad > hf:
            outs.append(jnp.zeros((td, hf_pad - hf), jnp.float32))
        # Single lane-dense (multiple-of-128) store for all heads.
        out_ref[...] = (jnp.concatenate(outs, axis=-1)
                        + bias_ref[...]).astype(out_ref.dtype)


# ------------------------------ layer wrapper --------------------------------

def gat_conv(x_b, w, al, ar, bias, adj_bias, num_heads, out_feats, *,
             tile_dst=None, tile_src=None):
    """One GATConv layer.

    x_b: (N, Din_pad) bf16 activations (128-lane padded, pad lanes zero).
    Returns (N, round_up(H*F, 128)) bf16 with zero pad lanes.
    """
    n, xin = x_b.shape
    din, hf_w = w.shape
    hf = num_heads * out_feats
    assert hf_w == hf and xin >= din, (w.shape, x_b.shape)
    hf_pad = _round_up(hf, 128)
    f1 = out_feats + 1
    budget = _vmem_budget_bytes()

    # Host-side parameter prep: fold el/er logits into the projection matmul
    # and zero-pad weight rows up to the padded activation width.
    w_aug = jnp.concatenate([w, w @ _block_diag(al), w @ _block_diag(ar)], axis=1)
    wout = hf + 2 * num_heads
    wout_pad = _round_up(wout, 128)
    w_aug = jnp.pad(w_aug, ((0, xin - din), (0, wout_pad - wout))).astype(jnp.bfloat16)
    bias_pad = jnp.pad(bias, ((0, 0), (0, hf_pad - hf)))

    # ---- stage 1: one lane-dense bf16 slab [feat | el | er | 0] --------------
    t1 = _pick_stage1_tile(n)
    combined = pl.pallas_call(
        _project_kernel,
        out_shape=jax.ShapeDtypeStruct((n, wout_pad), jnp.bfloat16),
        grid=(n // t1,),
        in_specs=[
            pl.BlockSpec((t1, xin), lambda i: (i, 0)),
            pl.BlockSpec((xin, wout_pad), lambda i: (0, 0)),
        ],
        out_specs=pl.BlockSpec((t1, wout_pad), lambda i: (i, 0)),
        compiler_params=pltpu.CompilerParams(
            dimension_semantics=("parallel",), vmem_limit_bytes=budget),
    )(x_b, w_aug)

    # ---- layout plumbing (cheap XLA, O(N*hf)): head-major feat + ones column -
    feat = combined[:, :hf]
    feat_aug = jnp.concatenate(
        [feat.reshape(n, num_heads, out_feats).transpose(1, 0, 2),
         jnp.ones((num_heads, n, 1), jnp.bfloat16)], axis=-1)       # (H, N, F+1)
    el = combined[:, hf:hf + num_heads].astype(jnp.float32).T.reshape(
        num_heads, 1, n)                                            # (H, 1, N) src terms
    er = combined[:, hf + num_heads:hf + 2 * num_heads].astype(jnp.float32).T.reshape(
        num_heads, n, 1)                                            # (H, N, 1) dst terms

    # ---- stage 2: tiled masked softmax + aggregation -------------------------
    auto_td, auto_ts = (None, None)
    if tile_dst is None or tile_src is None:
        auto_td, auto_ts = _pick_stage2_tiles(n, num_heads, hf_pad, budget)
    td = tile_dst if tile_dst is not None else auto_td
    ts = tile_src if tile_src is not None else auto_ts
    assert n % td == 0 and (td % 8 == 0 or td == n), (n, td)
    assert n % ts == 0 and (ts % 128 == 0 or ts == n), (n, ts)

    kernel = functools.partial(
        _gat_attn_kernel, num_heads=num_heads, out_feats=out_feats,
        hf=hf, hf_pad=hf_pad, negative_slope=0.2)
    out = pl.pallas_call(
        kernel,
        out_shape=jax.ShapeDtypeStruct((n, hf_pad), jnp.bfloat16),
        grid=(n // td, n // ts),
        in_specs=[
            pl.BlockSpec((td, ts), lambda i, j: (i, j)),               # adj bias tile
            pl.BlockSpec((num_heads, 1, ts), lambda i, j: (0, 0, j)),  # el (src terms)
            pl.BlockSpec((num_heads, td, 1), lambda i, j: (0, i, 0)),  # er (dst terms)
            pl.BlockSpec((num_heads, ts, f1), lambda i, j: (0, j, 0)), # feat_aug
            pl.BlockSpec((1, hf_pad), lambda i, j: (0, 0)),            # bias (padded)
        ],
        out_specs=pl.BlockSpec((td, hf_pad), lambda i, j: (i, 0)),
        scratch_shapes=[pltpu.VMEM((num_heads, td, 1), jnp.float32),   # running max
                        pltpu.VMEM((num_heads, td, f1), jnp.float32)], # acc (+denom)
        compiler_params=pltpu.CompilerParams(
            dimension_semantics=("parallel", "arbitrary"),
            vmem_limit_bytes=budget),
    )(adj_bias, el, er, feat_aug, bias_pad)
    return out


# ------------------------------- model wrapper --------------------------------

def init_gat_params(key, in_feats, num_heads, n_hidden, n_classes, n_layers):
    """Deterministic synthetic parameters matching DGL GATConv shapes."""
    layers = []
    in_dim = in_feats
    for layer_idx in range(n_layers):
        if layer_idx < n_layers - 1:
            h, f = num_heads, n_hidden
        else:
            h, f = 1, n_classes
        key, k1, k2, k3 = jax.random.split(key, 4)
        scale = (2.0 / (in_dim + h * f)) ** 0.5
        w = jax.random.normal(k1, (in_dim, h * f), jnp.float32) * scale  # fc weight (transposed)
        al = jax.random.normal(k2, (h, f), jnp.float32) * 0.1            # attn_l
        ar = jax.random.normal(k3, (h, f), jnp.float32) * 0.1            # attn_r
        bias = jnp.zeros((1, h * f), jnp.float32)                        # GATConv bias
        layers.append((w, al, ar, bias, h, f))
        in_dim = h * f
    return layers


def gat_forward(layers, adj, x, *, tile_dst=None, tile_src=None):
    # Additive mask streamed once as bf16 (same bytes as a 0/1 adjacency):
    # 0 on edges (self-loops included), -1e30 elsewhere.
    adj_bias = jnp.where(adj > 0, 0.0, -1e30).astype(jnp.bfloat16)
    h = x.astype(jnp.bfloat16)
    for (w, al, ar, bias, nh, nf) in layers:
        # Activations stay 128-lane padded bf16 between layers (no per-layer slice).
        h = gat_conv(h, w, al, ar, bias, adj_bias, nh, nf,
                     tile_dst=tile_dst, tile_src=tile_src)
    nh_last, nf_last = layers[-1][4], layers[-1][5]
    # Last layer has 1 head, so the mean over heads is the identity; strip the
    # lane padding exactly once at the very end.
    return h[:, :nh_last * nf_last].astype(jnp.float32)


def _gat_reference(layers, adj, x):
    """Pure-JAX fp32 reference of the same forward pass (for sanity checking)."""
    h = x
    for (w, al, ar, bias, nh, nf) in layers:
        feat = h @ w
        outs = []
        for hd in range(nh):
            fh = feat[:, hd * nf:(hd + 1) * nf]
            el = (fh * al[hd]).sum(-1)
            er = (fh * ar[hd]).sum(-1)
            e = er[:, None] + el[None, :]
            e = jnp.where(e > 0, e, 0.2 * e)
            e = jnp.where(adj > 0, e, -jnp.inf)
            a = jax.nn.softmax(e, axis=-1)
            outs.append(a @ fh)
        h = jnp.concatenate(outs, axis=-1) + bias
    return h


if __name__ == "__main__":
    N = 256
    in_feats = 32
    num_heads = 4
    n_hidden = 16
    n_classes = 8
    n_layers = 3

    key = jax.random.PRNGKey(0)
    key, kx, ka = jax.random.split(key, 3)

    x = jax.random.normal(kx, (N, in_feats), jnp.float32)
    # Random sparse directed graph, plus self-loops so every dst has >= 1 in-edge
    # (required: the edge softmax assumes at least one unmasked entry per row).
    adj = (jax.random.uniform(ka, (N, N)) < 0.05).astype(jnp.float32)
    adj = jnp.maximum(adj, jnp.eye(N, dtype=jnp.float32))

    params = init_gat_params(key, in_feats, num_heads, n_hidden, n_classes, n_layers)

    # tile_dst=64, tile_src=128 -> stage-2 grid (4, 2): exercises both the
    # parallel dst axis and the online-softmax accumulation across src tiles.
    out = gat_forward(params, adj, x, tile_dst=64, tile_src=128)
    out = jax.block_until_ready(out)
    assert out.shape == (N, n_classes), out.shape
    assert bool(jnp.all(jnp.isfinite(out)))

    # Loose sanity check vs. fp32 reference (bf16 MXU + approx reciprocal noise).
    ref = _gat_reference(params, adj, x)
    max_err = float(jnp.max(jnp.abs(out - ref)))
    assert max_err < 0.25, max_err

    print("KERNEL_OK")
</pallas_src>

<mosaic_0001>
module attributes {stable_mosaic.version = 11 : i64} {
  func.func @_project_kernel(%arg0: i32, %arg1: memref<128x32xbf16, #tpu.memory_space<vmem>>, %arg2: memref<32x128xbf16, #tpu.memory_space<vmem>>, %arg3: memref<128x128xbf16, #tpu.memory_space<vmem>>) attributes {dimension_semantics = [#tpu.dimension_semantics<parallel>], iteration_bounds = array<i64: 2>, scalar_prefetch = 0 : i64, scratch_operands = 0 : i64, tpu.core_type = #tpu.core_type<tc>, window_params = [{transform_indices = @transform_0, window_bounds = array<i64: 128, 32>}, {pipeline_mode = #tpu.pipeline_mode<synchronous>, transform_indices = @transform_1, window_bounds = array<i64: 32, 128>}, {transform_indices = @transform_2, window_bounds = array<i64: 128, 128>}]} {
    %c0 = arith.constant 0 : index
    %c0_0 = arith.constant 0 : index
    %0 = vector.load %arg1[%c0, %c0_0] : memref<128x32xbf16, #tpu.memory_space<vmem>>, vector<128x32xbf16>
    %c0_1 = arith.constant 0 : index
    %c0_2 = arith.constant 0 : index
    %1 = vector.load %arg2[%c0_1, %c0_2] : memref<32x128xbf16, #tpu.memory_space<vmem>>, vector<32x128xbf16>
    %cst = arith.constant dense<0.000000e+00> : vector<128x128xf32>
    %2 = tpu.matmul %0, %1, %cst {dimension_numbers = #tpu.dot_dimension_numbers<[1], [0], [0], [1], [0, 0, 1, 1], [], []>} : vector<128x32xbf16>, vector<32x128xbf16>, vector<128x128xf32> -> vector<128x128xf32>
    %3 = arith.truncf %2 : vector<128x128xf32> to vector<128x128xbf16>
    %c0_3 = arith.constant 0 : index
    %c0_4 = arith.constant 0 : index
    %4 = vector.load %arg3[%c0_3, %c0_4] : memref<128x128xbf16, #tpu.memory_space<vmem>>, vector<128x128xbf16>
    tpu.vector_store %arg3[%c0_3, %c0_4], %3 {strides = array<i32>} : memref<128x128xbf16, #tpu.memory_space<vmem>>, vector<128x128xbf16>,
    return
  }
  func.func @transform_0(%arg0: i32) -> (i32, i32) {
    %c0_i32 = arith.constant 0 : i32
    %c0_i32_0 = arith.constant 0 : i32
    return %arg0, %c0_i32 : i32, i32
  }
  func.func @transform_1(%arg0: i32) -> (i32, i32) {
    %c0_i32 = arith.constant 0 : i32
    %c0_i32_0 = arith.constant 0 : i32
    %c0_i32_1 = arith.constant 0 : i32
    return %c0_i32, %c0_i32_0 : i32, i32
  }
  func.func @transform_2(%arg0: i32) -> (i32, i32) {
    %c0_i32 = arith.constant 0 : i32
    %c0_i32_0 = arith.constant 0 : i32
    return %arg0, %c0_i32 : i32, i32
  }
}

</mosaic_0001>

<bundles_post_ra>
// kernel: tpu_custom_call.1
= control target key start
LH: loop header
LB: loop body
LE: loop exit
PB: predicated region body
PF: predicated region fallthrough
CT: control target
= control target key end

     0   :  { %7 = vsyncpa [#allocation3], 0  ;;  %s893_s0 = inlined_call_operand.vmem [shape: bf16[256,32], index: 0, kind: input, shape index: {}]   ;;  %s894_s1 = inlined_call_operand.vmem [shape: bf16[32,128], index: 1, kind: input, shape index: {}]   ;;  %s895_s2 = inlined_call_operand.hbm [shape: bf16[256,128], index: 2, kind: output, shape index: {}]  }
   0x1   :  { %9 = vsyncpa [#allocation3 + $0x1], 0  ;;  %s773_s9 = smov 0   ;;  %s775_s10 = smov 0  }
   0x2   :  { %s777_s11 = smov 0   ;;  %s779_s12 = smov 0  }
   0x3 LB: > { %s794_s13 = sadd.s32 4294967295, %s753_s12   ;;  %s496_s14 = sadd.s32 4294967294, %s753_s12   ;;  %s753_s12 = sphi %s779_s12, %s901_s12   ;;  %s749_s11 = sphi %s777_s11, %s900_s11   ;;  %s745_s10 = sphi %s775_s10, %s899_s10   ;;  %s741_s9 = sphi %s773_s9, %s898_s9  }
   0x4   : > { %s798_s15 = sadd.s32 1, %s753_s12   ;;  %s69_s16 = sadd.s32 1, %s749_s11 }
   0x5   : > { %s66_s17 = ssub.s32 %s753_s12, %s798_s15  ;;  %p79_p0 = scmp.ne.s32.totalorder %s749_s11, %s745_s10 }
   0x6   : > { %p67_p1 = scmp.eq.s32.totalorder %s66_s17, 0  ;;  %p80_p2 = scmp.eq.s32.totalorder %s794_s13, 1 }
   0x7   : > { %p85_p3 = scmp.ne.s32.totalorder %s745_s10, %s741_s9  ;;  %p86_p4 = scmp.eq.s32.totalorder %s496_s14, 1 }
   0x8   : > { %s809_s18 = scalar_select %p67_p1, %s749_s11, %s69_s16  }
   0x9   : > { %p811_p5 = por %p80_p2, %p79_p0  ;;  %p815_p6 = por %p86_p4, %p85_p3 }
   0xa   : > { %p499_p7 = scmp.ge.s32.totalorder %s753_s12, 1  ;;  %p116_p8 = scmp.lt.s32.totalorder %s753_s12, 3 }
   0xc   : > { %p117_p9 = pnand %p499_p7, %p116_p8 }
   0xd   : > { %v681_v0 = vld [vmem:[%s894_s1] sm:$0xff] (!%p117_p9)   ;;  %s501_s23 = sshll.u32 (!%p117_p9), %s794_s13, 4  ;;  %v682_v1 = vld [vmem:[%s894_s1 + $0x8] sm:$0xff] (!%p117_p9)   ;;  %vm218_vm0 = vcmask (!%p117_p9), 261120   ;;  %s135_s30 = sand.u32 (!%p117_p9), 1, %s745_s10  }
   0xe   : > { %120 = sbr.rel (%p117_p9) target bundleno = 267 (0x10b), region = 28  ;;  %p139_p10 = scmp.lt.s32.totalorder (!%p117_p9), %s501_s23, 31  ;;  %616 = vmatprep.subr.bf16.mxu0 (!%p117_p9), %v681_v0  ;;  %636 = vmatprep.subr.bf16.mxu1 (!%p117_p9), %v681_v0 }
   0xf   : > { %617 = vmatpush3.bf16.msra.mxu0 (!%p117_p9), %v681_v0  ;;  %638 = vmatpush3.bf16.msra.mxu1 (!%p117_p9), %v681_v0  ;;  %s500_s3 = sshll.u32 (!%p117_p9), %s135_s30, 6  ;;  %s558_s5 = sshll.u32 (!%p117_p9), %s794_s13, 10 }
  0x10   : > { %618 = vmatprep.subr.bf16.mxu0 (!%p117_p9), %v682_v1  ;;  %637 = vmatprep.subr.bf16.mxu1 (!%p117_p9), %v682_v1  ;;  %s137_s4 = scalar_lea.vmem (!%p117_p9), [#allocation2], %s500_s3  ;;  %s846_s14 = scalar_lea.hbm (!%p117_p9), %s895_s2, %s558_s5 }
  0x11   : > { %s434_s6 = sshll.u32 (!%p117_p9), %s137_s4, 4  ;;  %s852_s13 = scalar_lea.sflag (!%p117_p9), [#allocation3], %s135_s30  ;;  %s848_s6 = int_to_ptr.vmem [resolvable:$true] %s434_s6 }
  0x12   : > { %s691_s16 = scalar_lea.vmem (!%p117_p9), %s848_s6, 1024  ;;  %s755_s17 = smov (!%p117_p9), [#allocation2]  }
  0x13   : > { %619 = vmatpush3.bf16.msra.mxu0 (!%p117_p9), %v682_v1  ;;  %639 = vmatpush3.bf16.msra.mxu1 (!%p117_p9), %v682_v1  ;;  %p692_p11 = scmp.ne.s32.totalorder (!%p117_p9), %s848_s6, %s691_s16  ;;  %s695_s21 = sshll.u32 (!%p117_p9), %s755_s17, 4  ;;  %s696_s21 = int_to_ptr.vmem [resolvable:$false] %s695_s21 }
  0x14   : > { %s697_s22 = scalar_lea.vmem (!%p117_p9), %s696_s21, 2048  ;;  %p698_p0 = scmp.lt.s32.totalorder (!%p117_p9), %s848_s6, %s696_s21 }
  0x15   : > { %s903_s23 = smov (!%p139_p10, %s501_s23), 31  ;;  %p693_p12 = pnand %p692_p11, %p811_p5 }
  0x16   : > { %s502_s26 = sshll.u32 %s903_s23, 2  ;;  %p699_p1 = scmp.lt.s32.totalorder %s697_s22, %s691_s16 }
  0x17   : > { %s142_s29 = scalar_lea.vmem %s893_s0, %s502_s26  ;;  %p694_p13 = pneg %p693_p12 }
  0x18   : > { %v683_v2 = vld [vmem:[%s142_s29] sm:$0xff]   ;;  %v685_v4 = vld [vmem:[%s142_s29 + $0x8] sm:$0xff]   ;;  %v687_v6 = vld [vmem:[%s142_s29 + $0x10] sm:$0xff]   ;;  %p700_p2 = por %p699_p1, %p698_p0 }
  0x19   : > { %v684_v3 = vld [vmem:[%s142_s29 + $0x20] sm:$0xff]   ;;  %620 = vmatprep.mubr.msk.bf16.mxu0 %vm218_vm0, %v683_v2  ;;  %v686_v5 = vld [vmem:[%s142_s29 + $0x28] sm:$0xff]   ;;  %v688_v7 = vld [vmem:[%s142_s29 + $0x30] sm:$0xff]  }
  0x1a   : > { %628 = vmatprep.mubr.msk.bf16.mxu1 %vm218_vm0, %v684_v3  ;;  %621 = vmatmul.mubr.msk.bf16.vlgmr.msra.gmra.mrb[0].mxu0 %vm218_vm0, %v685_v4  ;;  %v689_v8 = vld [vmem:[%s142_s29 + $0x18] sm:$0xff]   ;;  %p701_p3 = pnand %p700_p2, %p694_p13 }
  0x1b   : > { %629 = vmatmul.mubr.msk.bf16.vlgmr.msra.gmra.mrb[0].mxu1 %vm218_vm0, %v686_v5  ;;  %624 = vmatprep.mubr.msk.bf16.mxu0 %vm218_vm0, %v687_v6  ;;  %v690_v9 = vld [vmem:[%s142_s29 + $0x38] sm:$0xff]  }
  0x1c   : > { %632 = vmatprep.mubr.msk.bf16.mxu1 %vm218_vm0, %v688_v7 }
  0x22   : > { %625 = vmatmul.mubr.msk.bf16.gmra.mrb[4].mxu0 %vm218_vm0, %v689_v8 }
  0x23   : > { %633 = vmatmul.mubr.msk.bf16.gmra.mrb[4].mxu1 %vm218_vm0, %v690_v9 }
  0xed   : > { %v622_v10 = vpop.f32.mrb[0].mxu0 }
  0xee   : > { %v630_v11 = vpop.f32.mrb[0].mxu1  ;;  %v277_v12 = vpop.f32.mrb[1].mxu0 }
  0xef   : > { %v309_v13 = vpop.f32.mrb[1].mxu1  ;;  %v623_v14 = vpop.f32.mrb[2].mxu0 }
  0xf0   : > { %v567_v15 = vpack.c.bf16 %v623_v14, %v622_v10  ;;  %v631_v16 = vpop.f32.mrb[2].mxu1  ;;  %v280_v17 = vpop.f32.mrb[3].mxu0 }
  0xf1   : > { %v587_v18 = vpack.c.bf16 %v631_v16, %v630_v11  ;;  %v562_v19 = vpack.c.bf16 %v280_v17, %v277_v12  ;;  %v312_v20 = vpop.f32.mrb[3].mxu1 }
  0xf2   : > { %599 = vst [vmem:[%s137_s4 + $0x8] sm:$0xff] %v567_v15   ;;  %v582_v21 = vpack.c.bf16 %v312_v20, %v309_v13 }
  0xf3   : > { %603 = vst [vmem:[%s137_s4 + $0x28] sm:$0xff] %v587_v18   ;;  %563 = vst [vmem:[%s137_s4] sm:$0xff] %v562_v19  }
  0xf4   : > { %602 = vst [vmem:[%s137_s4 + $0x20] sm:$0xff] %v582_v21  }
  0xf5   : > { %v626_v22 = vpop.f32.mrb[4].mxu0 }
  0xf6   : > { %v634_v23 = vpop.f32.mrb[4].mxu1  ;;  %v293_v24 = vpop.f32.mrb[5].mxu0 }
  0xf7   : > { %v325_v25 = vpop.f32.mrb[5].mxu1  ;;  %v627_v26 = vpop.f32.mrb[6].mxu0 }
  0xf8   : > { %v577_v27 = vpack.c.bf16 %v627_v26, %v626_v22  ;;  %v635_v28 = vpop.f32.mrb[6].mxu1  ;;  %v296_v29 = vpop.f32.mrb[7].mxu0 }
  0xf9   : > { %v597_v30 = vpack.c.bf16 %v635_v28, %v634_v23  ;;  %v572_v31 = vpack.c.bf16 %v296_v29, %v293_v24  ;;  %v328_v32 = vpop.f32.mrb[7].mxu1 }
  0xfa   : > { %601 = vst [vmem:[%s137_s4 + $0x18] sm:$0xff] %v577_v27   ;;  %v592_v33 = vpack.c.bf16 %v328_v32, %v325_v25 }
  0xfb   : > { %605 = vst [vmem:[%s137_s4 + $0x38] sm:$0xff] %v597_v30   ;;  %600 = vst [vmem:[%s137_s4 + $0x10] sm:$0xff] %v572_v31  }
  0xfc   : > { %604 = vst [vmem:[%s137_s4 + $0x30] sm:$0xff] %v592_v33  }
  0xfd   : > { %704 = shalt.err (!%p701_p3)
}
  0xfe   : > { %s705_s23 = scalar_lea.hbm %s846_s14, 1024  ;;  %s709_s26 = scalar_lea.hbm %s895_s2, 2048 }
  0xff   : > { %p706_p4 = scmp.ne.s32.totalorder %s846_s14, %s705_s23  ;;  %p710_p9 = scmp.lt.u32.totalorder %s846_s14, %s895_s2 }
 0x100   : > { %p711_p10 = scmp.lt.u32.totalorder %s709_s26, %s705_s23  ;;  %p713_p12 = scmp.lt.u32.totalorder %s705_s23, %s846_s14 }
 0x101   : > { %p707_p7 = pnand %p706_p4, %p811_p5 }
 0x102   : > { %p712_p11 = por %p711_p10, %p710_p9 }
 0x103   : > { %p708_p8 = pneg %p707_p7 }
 0x104   : > { %p714_p13 = por %p713_p12, %p712_p11 }
 0x106   : > { %p715_p0 = pnand %p714_p13, %p708_p8 }
 0x108   : > { %718 = shalt.err (!%p715_p0)
}
 0x109   : > { %s756_s29 = smov 64   ;;  %s757_s30 = smov 4  }
 0x10a   : > { %640 = dma.vmem_to_hbm [thread:$0]  (%p811_p5), %s848_s6, 1024, %s846_s14, %s852_s13, %s756_s29, %s756_s29, %s757_s30  }
 0x10b PF: > { %p646_p1 = scmp.ge.s32.totalorder %s753_s12, 2  ;;  %s449_s3 = sand.u32 1, %s741_s9  }
 0x10c   : > { %s450_s4 = scalar_lea.sflag [#allocation3], %s449_s3 }
 0x10d   : > { %p643_p2 = pnand %p646_p1, %p815_p6 }
 0x10f   : > { %736 = dma.done.wait (!%p643_p2), %s450_s4, 1024  }
 0x110   : > { %738 = vsyncadd (!%p643_p2), %s450_s4, 4294966272  ;;  %p12_p3 = scmp.ge.s32.totalorder %s798_s15, 4   ;;  %s898_s9 = smov %s745_s10 }
 0x111   : > { %s899_s10 = smov %s749_s11  ;;  %s900_s11 = smov %s809_s18 }
 0x112   : > { %s901_s12 = smov %s798_s15  ;;  %14 = sbr.rel (!%p12_p3) target bundleno = 3 (0x3), region = 63 }
 0x119   :  { %455 = vsyncpa [#allocation3], 1 }
 0x11a   :  { %457 = vsyncpa [#allocation3 + $0x1], 1 }

</bundles_post_ra>
